<compile_context>
chip_gen: v7x
topology: tpu7x:2x2x1
jax: 0.10.0
libtpu: 0.0.40
codegen_flags: <defaults>
</compile_context>

<pallas_src>
import math

import jax
import jax.numpy as jnp
from jax.experimental import pallas as pl
from jax.experimental.pallas import tpu as pltpu

LANES = 128                          # vreg lane width — last dim of every tile
TILE_BYTES_TARGET = 2 * 1024 * 1024  # ~2 MiB per stream per tile


def _round_up(a: int, m: int) -> int:
    return (a + m - 1) // m * m


def _sublane(dtype) -> int:
    """Sublane multiple for a dtype: 8 (f32), 16 (bf16), 32 (int8/fp8)."""
    bits = jnp.dtype(dtype).itemsize * 8
    return max(8, 256 // bits)


# ---------------------------------------------------------------------------
# Kernels: lane-dense (TR, 128) tiles, per-row f32 scale broadcast over lanes.
# ---------------------------------------------------------------------------
def _drop_path_kernel(s_ref, x_ref, o_ref):
    # o = s * x
    o_ref[...] = x_ref[...] * s_ref[...].astype(o_ref.dtype)


def _residual_drop_path_kernel(s_ref, res_ref, br_ref, o_ref):
    # o = residual + s * branch   (fused Block-level residual add)
    o_ref[...] = res_ref[...] + br_ref[...] * s_ref[...].astype(o_ref.dtype)


def _per_sample_scale(key, batch: int, keep_prob: float):
    # floor(keep_prob + u) is 1 with prob keep_prob else 0 (PyTorch drop_path).
    u = jax.random.uniform(key, (batch,), dtype=jnp.float32)
    return jnp.floor(jnp.float32(keep_prob) + u) * jnp.float32(1.0 / keep_prob)


def _apply_scaled(residual, branch, scale):
    """o = (residual +) scale[b] * branch, streamed as a (B*R, 128) slab."""
    orig_shape = branch.shape
    dtype = branch.dtype
    B = orig_shape[0]
    L = int(math.prod(orig_shape[1:])) if len(orig_shape) > 1 else 1

    Lp = _round_up(max(L, 1), LANES)
    pad = Lp - L
    R = Lp // LANES
    rows = B * R

    def to_rows(a):
        a2 = a.astype(dtype).reshape(B, L)
        if pad:
            # Ragged fallback only (L % 128 != 0); aligned shapes are a bitcast.
            a2 = jnp.pad(a2, ((0, 0), (0, pad)))
        return a2.reshape(rows, LANES)

    br_rows = to_rows(branch)
    # Per-row scale (each sample's scale repeated over its R rows) — tiny stream.
    s_rows = jnp.repeat(scale.astype(jnp.float32), R).reshape(rows, 1)

    # Tile: ~TILE_BYTES_TARGET per stream, sublane-multiple rows; aim for >= 4
    # grid steps when there is enough work so both v7x TensorCores get a share.
    sub = _sublane(dtype)
    row_bytes = LANES * jnp.dtype(dtype).itemsize
    tr = max(sub, (TILE_BYTES_TARGET // row_bytes) // sub * sub)
    tr = max(sub, min(tr, _round_up(pl.cdiv(rows, 4), sub)))
    grid = (pl.cdiv(rows, tr),)

    row_spec = pl.BlockSpec((tr, LANES), lambda i: (i, 0))
    s_spec = pl.BlockSpec((tr, 1), lambda i: (i, 0))

    elem_bytes = rows * LANES * jnp.dtype(dtype).itemsize
    if residual is None:
        kernel = _drop_path_kernel
        operands = (s_rows, br_rows)
        in_specs = [s_spec, row_spec]
        flops = rows * LANES
        bytes_accessed = 2 * elem_bytes + s_rows.size * 4
    else:
        kernel = _residual_drop_path_kernel
        operands = (s_rows, to_rows(residual), br_rows)
        in_specs = [s_spec, row_spec, row_spec]
        flops = 2 * rows * LANES
        bytes_accessed = 3 * elem_bytes + s_rows.size * 4

    # NOTE: when the branch buffer is dead after this op, adding
    # input_output_aliases={len(operands)-1: 0} saves an HBM allocation
    # (capacity only).  Left off so callers keep ownership of their inputs.
    out = pl.pallas_call(
        kernel,
        out_shape=jax.ShapeDtypeStruct((rows, LANES), dtype),
        grid=grid,
        in_specs=in_specs,
        out_specs=row_spec,
        compiler_params=pltpu.CompilerParams(
            dimension_semantics=("parallel",),
            vmem_limit_bytes=32 * 1024 * 1024,
        ),
        cost_estimate=pl.CostEstimate(
            flops=int(flops), transcendentals=0, bytes_accessed=int(bytes_accessed)
        ),
    )(*operands)

    out = out.reshape(B, Lp)
    if pad:
        out = out[:, :L]
    return out.reshape(orig_shape)


def drop_path(x, drop_prob: float = 0.0, training: bool = False, key=None):
    """Standalone drop_path(x) with PyTorch semantics."""
    if drop_prob == 0.0 or not training:
        return x
    keep_prob = 1.0 - float(drop_prob)
    if keep_prob <= 0.0:
        return jnp.zeros_like(x)          # every sample dropped; avoid 1/0 NaN
    if key is None:
        raise ValueError("drop_path needs an explicit PRNG key when stochastic")
    scale = _per_sample_scale(key, x.shape[0], keep_prob)
    return _apply_scaled(None, x, scale)


def residual_drop_path(residual, branch, drop_prob: float = 0.0,
                       training: bool = False, key=None):
    """Fused `residual + drop_path(branch)` — the Block call-site, one HBM pass."""
    B = branch.shape[0]
    if drop_prob == 0.0 or not training:
        scale = jnp.ones((B,), dtype=jnp.float32)     # identity drop_path
    else:
        keep_prob = 1.0 - float(drop_prob)
        if keep_prob <= 0.0:
            return residual                            # branch fully dropped
        if key is None:
            raise ValueError("residual_drop_path needs a PRNG key when stochastic")
        scale = _per_sample_scale(key, B, keep_prob)
    return _apply_scaled(residual, branch, scale)


class DropPath:
    """Mirror of the PyTorch DropPath module used inside SAAEHead's Blocks."""

    def __init__(self, drop_prob=None):
        self.drop_prob = drop_prob if drop_prob is not None else 0.0
        self.training = True

    def __call__(self, x, key=None):
        return drop_path(x, self.drop_prob, self.training, key=key)


if __name__ == "__main__":
    root = jax.random.PRNGKey(0)
    kx, kb, kd, kw = jax.random.split(root, 4)

    # Block-level residual shapes inside SAAEHead (embed_dim=256), small seq.
    B, N, D = 2, 8, 256
    x = jax.random.normal(kx, (B, N, D), dtype=jnp.float32)   # residual
    y = jax.random.normal(kb, (B, N, D), dtype=jnp.float32)   # branch (attn/mlp)

    drop_prob = 0.25
    keep_prob = 1.0 - drop_prob

    # --- fused residual + drop_path(branch), training mode ------------------
    out_train = jax.block_until_ready(
        residual_drop_path(x, y, drop_prob, training=True, key=kd))
    u = jax.random.uniform(kd, (B,), dtype=jnp.float32)
    mask = jnp.floor(jnp.float32(keep_prob) + u)
    ref = x + y * (mask * jnp.float32(1.0 / keep_prob))[:, None, None]
    assert jnp.allclose(out_train, ref, rtol=1e-5, atol=1e-5)

    # --- eval mode: identity drop_path -> plain residual add ----------------
    out_eval = jax.block_until_ready(
        residual_drop_path(x, y, drop_prob, training=False))
    assert jnp.allclose(out_eval, x + y, rtol=1e-6, atol=1e-6)

    # --- standalone drop_path: each sample all-zero or x / keep_prob --------
    mod = DropPath(drop_prob)
    z = jax.block_until_ready(mod(y, key=kd))
    for b in range(B):
        zb = z[b]
        ok = bool(jnp.allclose(zb, 0.0)) or bool(
            jnp.allclose(zb, y[b] * (1.0 / keep_prob), rtol=1e-5, atol=1e-5))
        assert ok, "per-sample DropPath semantics violated"

    mod.training = False
    assert jnp.allclose(jax.block_until_ready(mod(y)), y)

    # --- drop_prob == 1 edge case: branch fully dropped, no NaNs ------------
    assert jnp.allclose(
        jax.block_until_ready(residual_drop_path(x, y, 1.0, training=True, key=kd)), x)
    assert jnp.allclose(
        jax.block_until_ready(drop_path(y, 1.0, training=True, key=kd)), 0.0)

    # --- ragged shape exercising the pad fallback (L % 128 != 0) ------------
    w = jax.random.normal(kw, (2, 5, 7), dtype=jnp.float32)
    w_out = jax.block_until_ready(drop_path(w, drop_prob, training=True, key=kd))
    for b in range(2):
        ok = bool(jnp.allclose(w_out[b], 0.0)) or bool(
            jnp.allclose(w_out[b], w[b] * (1.0 / keep_prob), rtol=1e-5, atol=1e-5))
        assert ok, "ragged-shape DropPath semantics violated"

    print("KERNEL_OK")
</pallas_src>

<mosaic_0001>
module attributes {stable_mosaic.version = 11 : i64} {
  func.func @_residual_drop_path_kernel(%arg0: i32, %arg1: memref<8x1xf32, #tpu.memory_space<vmem>>, %arg2: memref<8x128xf32, #tpu.memory_space<vmem>>, %arg3: memref<8x128xf32, #tpu.memory_space<vmem>>, %arg4: memref<8x128xf32, #tpu.memory_space<vmem>>) attributes {dimension_semantics = [#tpu.dimension_semantics<parallel>], iteration_bounds = array<i64: 4>, scalar_prefetch = 0 : i64, scratch_operands = 0 : i64, tpu.core_type = #tpu.core_type<tc>, window_params = [{transform_indices = @transform_0, window_bounds = array<i64: 8, 1>}, {transform_indices = @transform_1, window_bounds = array<i64: 8, 128>}, {transform_indices = @transform_2, window_bounds = array<i64: 8, 128>}, {transform_indices = @transform_3, window_bounds = array<i64: 8, 128>}]} {
    %c0 = arith.constant 0 : index
    %c0_0 = arith.constant 0 : index
    %0 = vector.load %arg2[%c0, %c0_0] : memref<8x128xf32, #tpu.memory_space<vmem>>, vector<8x128xf32>
    %c0_1 = arith.constant 0 : index
    %c0_2 = arith.constant 0 : index
    %1 = vector.load %arg3[%c0_1, %c0_2] : memref<8x128xf32, #tpu.memory_space<vmem>>, vector<8x128xf32>
    %c0_3 = arith.constant 0 : index
    %c0_4 = arith.constant 0 : index
    %2 = vector.load %arg1[%c0_3, %c0_4] : memref<8x1xf32, #tpu.memory_space<vmem>>, vector<8x1xf32>
    %3 = vector.broadcast %2 : vector<8x1xf32> to vector<8x128xf32>
    %4 = arith.mulf %1, %3 : vector<8x128xf32>
    %5 = arith.addf %0, %4 : vector<8x128xf32>
    %c0_5 = arith.constant 0 : index
    %c0_6 = arith.constant 0 : index
    %6 = vector.load %arg4[%c0_5, %c0_6] : memref<8x128xf32, #tpu.memory_space<vmem>>, vector<8x128xf32>
    tpu.vector_store %arg4[%c0_5, %c0_6], %5 {strides = array<i32>} : memref<8x128xf32, #tpu.memory_space<vmem>>, vector<8x128xf32>,
    return
  }
  func.func @transform_0(%arg0: i32) -> (i32, i32) {
    %c0_i32 = arith.constant 0 : i32
    %c0_i32_0 = arith.constant 0 : i32
    return %arg0, %c0_i32 : i32, i32
  }
  func.func @transform_1(%arg0: i32) -> (i32, i32) {
    %c0_i32 = arith.constant 0 : i32
    %c0_i32_0 = arith.constant 0 : i32
    return %arg0, %c0_i32 : i32, i32
  }
  func.func @transform_2(%arg0: i32) -> (i32, i32) {
    %c0_i32 = arith.constant 0 : i32
    %c0_i32_0 = arith.constant 0 : i32
    return %arg0, %c0_i32 : i32, i32
  }
  func.func @transform_3(%arg0: i32) -> (i32, i32) {
    %c0_i32 = arith.constant 0 : i32
    %c0_i32_0 = arith.constant 0 : i32
    return %arg0, %c0_i32 : i32, i32
  }
}

</mosaic_0001>

<bundles_post_ra>
// kernel: tpu_custom_call.1
= control target key start
LH: loop header
LB: loop body
LE: loop exit
PB: predicated region body
PF: predicated region fallthrough
CT: control target
= control target key end

     0   :  { %8 = vsyncpa [#allocation3], 0  ;;  %s689_s0 = inlined_call_operand.vmem [shape: f32[32,1], index: 0, kind: input, shape index: {}]   ;;  %s690_s1 = inlined_call_operand.vmem [shape: f32[32,128], index: 1, kind: input, shape index: {}]   ;;  %s691_s2 = inlined_call_operand.hbm [shape: f32[32,128], index: 2, kind: input, shape index: {}]   ;;  %s692_s3 = inlined_call_operand.hbm [shape: f32[32,128], index: 3, kind: output, shape index: {}]  }
   0x1   :  { %10 = vsyncpa [#allocation3 + $0x1], 0 }
   0x2   :  { %11 = vsyncpa [#allocation4], 0 }
   0x3   :  { %13 = vsyncpa [#allocation4 + $0x1], 0  ;;  %s522_s12 = smov 0   ;;  %s524_s13 = smov 0  }
   0x4   :  { %s526_s14 = smov 0   ;;  %s528_s15 = smov 0  }
   0x5 LB: > { %s543_s16 = sadd.s32 4294967295, %s497_s15   ;;  %s339_s17 = sadd.s32 4294967294, %s497_s15   ;;  %s497_s15 = sphi %s528_s15, %s706_s15   ;;  %s493_s14 = sphi %s526_s14, %s705_s14   ;;  %s489_s13 = sphi %s524_s13, %s704_s13   ;;  %s485_s12 = sphi %s522_s12, %s703_s12  }
   0x6   : > { %s547_s18 = sadd.s32 1, %s497_s15   ;;  %s78_s19 = sadd.s32 1, %s493_s14 }
   0x7   : > { %s75_s20 = ssub.s32 %s497_s15, %s547_s18  ;;  %p85_p0 = scmp.ne.s32.totalorder %s493_s14, %s489_s13 }
   0x8   : > { %p76_p1 = scmp.eq.s32.totalorder %s75_s20, 0  ;;  %p86_p2 = scmp.eq.s32.totalorder %s497_s15, 0 }
   0x9   : > { %p91_p3 = scmp.ne.s32.totalorder %s489_s13, %s485_s12  ;;  %p92_p4 = scmp.eq.s32.totalorder %s543_s16, 0 }
   0xa   : > { %s559_s21 = scalar_select %p76_p1, %s493_s14, %s78_s19  }
   0xb   : > { %p561_p5 = por %p86_p2, %p85_p0  ;;  %p565_p6 = por %p92_p4, %p91_p3 }
   0xc   : > { %p115_p7 = scmp.eq.s32.totalorder %s543_s16, 3  ;;  %p121_p8 = scmp.eq.s32.totalorder %s339_s17, 3 }
   0xd   : > { %p365_p9 = scmp.lt.s32.totalorder %s497_s15, 4  ;;  %s155_s26 = sand.u32 1, %s493_s14  }
   0xe   : > { %p571_p10 = por %p115_p7, %p85_p0  ;;  %p575_p11 = por %p121_p8, %p91_p3 }
   0xf   : > { %s343_s27 = sshll.u32 %s497_s15, 7  ;;  %s342_s28 = sshll.u32 %s155_s26, 3 }
  0x10   : > { %s696_s24 = scalar_select %p571_p10, 1, 0 }
  0x11   : > { %s697_s25 = scalar_select %p575_p11, 1, 0 }
  0x12   : > { %s584_s4 = scalar_lea.hbm %s691_s2, %s343_s27  ;;  %s159_s5 = scalar_lea.vmem [#allocation2], %s342_s28 }
  0x13   : > { %s166_s6 = sshll.u32 %s159_s5, 4  ;;  %p588_p12 = pnand %p365_p9, %p561_p5  ;;  %s592_s6 = int_to_ptr.vmem [resolvable:$true] %s166_s6 }
  0x14   : > { %s156_s8 = scalar_lea.sflag [#allocation3], %s155_s26  ;;  %s401_s9 = scalar_lea.hbm %s584_s4, 128 }
  0x15   : > { %p402_p1 = scmp.ne.s32.totalorder %s584_s4, %s401_s9  ;;  %p403_p2 = pneg %p588_p12 }
  0x16   : > { %s406_s17 = scalar_lea.hbm %s691_s2, 512  ;;  %p407_p5 = scmp.lt.u32.totalorder %s584_s4, %s691_s2 }
  0x17   : > { %p404_p3 = pnand %p403_p2, %p402_p1  ;;  %p408_p7 = scmp.lt.u32.totalorder %s406_s17, %s401_s9 }
  0x18   : > { %p410_p9 = scmp.lt.u32.totalorder %s401_s9, %s584_s4 }
  0x19   : > { %p405_p4 = pneg %p404_p3  ;;  %p409_p8 = por %p408_p7, %p407_p5 }
  0x1b   : > { %p411_p13 = por %p410_p9, %p409_p8 }
  0x1d   : > { %p412_p0 = pnand %p411_p13, %p405_p4 }
  0x1f   : > { %415 = shalt.err (!%p412_p0)
}
  0x20   : > { %s416_s22 = scalar_lea.vmem %s592_s6, 128  ;;  %s499_s26 = smov [#allocation2]  }
  0x21   : > { %p417_p1 = scmp.ne.s32.totalorder %s592_s6, %s416_s22  ;;  %s421_s27 = sshll.u32 %s499_s26, 4  ;;  %s422_s27 = int_to_ptr.vmem [resolvable:$false] %s421_s27 }
  0x22   : > { %s423_s28 = scalar_lea.vmem %s422_s27, 256  ;;  %p424_p10 = scmp.lt.s32.totalorder %s592_s6, %s422_s27 }
  0x23   : > { %p419_p3 = pnand %p417_p1, %p403_p2  ;;  %p425_p5 = scmp.lt.s32.totalorder %s423_s28, %s416_s22 }
  0x25   : > { %p420_p11 = pneg %p419_p3  ;;  %p426_p7 = por %p425_p5, %p424_p10 }
  0x27   : > { %p427_p8 = pnand %p426_p7, %p420_p11 }
  0x29   : > { %430 = shalt.err (!%p427_p8)
}
  0x2a   : > { %360 = dma.hbm_to_vmem [thread:$0]  (!%p588_p12), %s584_s4, 128, %s592_s6, %s156_s8  }
  0x2b   : > { %p699_p13 = scmp.lt.s32.totalorder %s497_s15, 5  ;;  %p700_p0 = scmp.ge.s32.totalorder %s497_s15, 1 }
  0x2d   : > { %p172_p2 = pnand %p700_p0, %p699_p13 }
  0x2e   : > { %s626_s29 = sand.u32 (!%p172_p2), 1, %s489_s13  }
  0x2f   : > { %175 = sbr.rel (%p172_p2) target bundleno = 208 (0xd0), region = 32  ;;  %s345_s30 = sshll.u32 (!%p172_p2), %s626_s29, 3 }
  0x30   : > { %s178_s5 = scalar_lea.sflag (!%p172_p2), [#allocation3], %s626_s29  ;;  %s181_s9 = scalar_lea.vmem (!%p172_p2), [#allocation2], %s345_s30 }
  0x36   : > { %476 = dma.done.wait (%p565_p6), %s178_s5, 128  }
  0x37   : > { %478 = vsyncadd (%p565_p6), %s178_s5, 4294967168  ;;  %p212_p10 = scmp.lt.s32.totalorder %s543_s16, 3  ;;  %v500_v0 = vmov 0   ;;  %v221_v2 = vld [vmem:[%s181_s9] sm:$0xff]  ;;  %s350_s19 = sshll.u32 %s543_s16, 7 }
  0x38   : > { %400 = vset.pattern.permute.xlu0 %v500_v0  ;;  %s211_s20 = scalar_lea.vmem [#allocation5], %s345_s30  ;;  %s646_s28 = scalar_lea.hbm %s692_s3, %s350_s19 }
  0x39   : > { %s213_s4 = scalar_select %p212_p10, %s543_s16, 3 }
  0x3a   : > { %s245_s22 = sshll.u32 %s211_s20, 4  ;;  %s232_s5 = scalar_lea.sflag [#allocation4], %s626_s29  ;;  %s648_s22 = int_to_ptr.vmem [resolvable:$true] %s245_s22 }
  0x3b   : > { %s347_s6 = sshll.u32 %s213_s4, 3  ;;  %s431_s9 = scalar_lea.vmem %s648_s22, 128 }
  0x3c   : > { %s215_s10 = scalar_lea.vmem %s689_s0, %s347_s6  ;;  %s219_s23 = scalar_lea.vmem %s690_s1, %s347_s6 }
  0x3d   : > { %v222_v1 = vld [vmem:[%s215_s10] sm:$0xff]  ;;  %p432_p6 = scmp.ne.s32.totalorder %s648_s22, %s431_s9  ;;  %p701_p11 = scmp.ne.s32.totalorder %s696_s24, 0 }
  0x3e   : > { %225 = vperm.xlu0 %400, %v222_v1   ;;  %v220_v4 = vld [vmem:[%s219_s23] sm:$0xff]  ;;  %s501_s16 = smov [#allocation5]  }
  0x3f   : > { %p433_p12 = pnand %p432_p6, %p701_p11  ;;  %s435_s30 = sshll.u32 %s501_s16, 4  ;;  %s436_s30 = int_to_ptr.vmem [resolvable:$false] %s435_s30 }
  0x40   : > { %s437_s4 = scalar_lea.vmem %s436_s30, 256  ;;  %p438_p9 = scmp.lt.s32.totalorder %s648_s22, %s436_s30 }
  0x41   : > { %p434_p4 = pneg %p433_p12  ;;  %p439_p1 = scmp.lt.s32.totalorder %s437_s4, %s431_s9 }
  0x43   : > { %p440_p3 = por %p439_p1, %p438_p9 }
  0x45   : > { %p441_p5 = pnand %p440_p3, %p434_p4 }
  0xbd   : > { %v226_v3 = vpop.permute.xlu0 %225 }
  0xbe   : > { %v228_v5 = vmul.f32 %v226_v3, %v221_v2 }
  0xc0   : > { %v229_v6 = vadd.f32 %v228_v5, %v220_v4 }
  0xc2   : > { %230 = vst [vmem:[%s211_s20] sm:$0xff] %v229_v6 }
  0xc3   : > { %444 = shalt.err (!%p441_p5)
}
  0xc4   : > { %s445_s29 = scalar_lea.hbm %s646_s28, 128  ;;  %s449_s8 = scalar_lea.hbm %s692_s3, 512 }
  0xc5   : > { %p446_p7 = scmp.ne.s32.totalorder %s646_s28, %s445_s29  ;;  %p450_p0 = scmp.lt.u32.totalorder %s646_s28, %s692_s3 }
  0xc6   : > { %p451_p2 = scmp.lt.u32.totalorder %s449_s8, %s445_s29  ;;  %p453_p6 = scmp.lt.u32.totalorder %s445_s29, %s646_s28 }
  0xc7   : > { %p447_p8 = pnand %p446_p7, %p701_p11 }
  0xc8   : > { %p452_p10 = por %p451_p2, %p450_p0 }
  0xc9   : > { %p448_p13 = pneg %p447_p8 }
  0xca   : > { %p454_p12 = por %p453_p6, %p452_p10 }
  0xcc   : > { %p455_p4 = pnand %p454_p12, %p448_p13 }
  0xce   : > { %458 = shalt.err (!%p455_p4)
}
  0xcf   : > { %355 = dma.vmem_to_hbm [thread:$0]  (%p701_p11), %s648_s22, 128, %s646_s28, %s232_s5  }
  0xd0 PF: > { %p366_p9 = scmp.ge.s32.totalorder %s497_s15, 2  ;;  %s257_s17 = sand.u32 1, %s485_s12  }
  0xd1   : > { %p702_p1 = scmp.ne.s32.totalorder %s697_s25, 0  ;;  %s258_s23 = scalar_lea.sflag [#allocation4], %s257_s17 }
  0xd3   : > { %p362_p3 = pnand %p366_p9, %p702_p1 }
  0xd5   : > { %480 = dma.done.wait (!%p362_p3), %s258_s23, 128  }
  0xd6   : > { %482 = vsyncadd (!%p362_p3), %s258_s23, 4294967168  ;;  %p16_p5 = scmp.ge.s32.totalorder %s547_s18, 6   ;;  %s703_s12 = smov %s489_s13 }
  0xd7   : > { %s704_s13 = smov %s493_s14  ;;  %s705_s14 = smov %s559_s21 }
  0xd8   : > { %s706_s15 = smov %s547_s18  ;;  %18 = sbr.rel (!%p16_p5) target bundleno = 5 (0x5), region = 83 }
  0xdf   :  { %263 = vsyncpa [#allocation3], 1 }
  0xe0   :  { %265 = vsyncpa [#allocation3 + $0x1], 1 }
  0xe1   :  { %266 = vsyncpa [#allocation4], 1 }
  0xe2   :  { %268 = vsyncpa [#allocation4 + $0x1], 1 }

</bundles_post_ra>
